<compile_context>
chip_gen: v7x
topology: tpu7x:2x2x1
jax: 0.10.0
libtpu: 0.0.40
codegen_flags: <defaults>
</compile_context>

<pallas_src>
from functools import partial

import jax
import jax.numpy as jnp
from jax.experimental import pallas as pl
from jax.experimental.pallas import tpu as pltpu

WIDTH = 96           # `width` in the torch script
HALF = WIDTH // 2    # 48
SIZE = WIDTH         # `size` must equal width for the cat() shapes to line up
PAD = 128            # hidden width padded to one full lane tile


def _linked_mlp_kernel(x_ref, w1_ref, b1_ref, w2_ref, b2_ref, w3_ref, o_ref):
    x = x_ref[...]

    # ---- layer 1: one fused (in_dim, 256) MXU matmul --------------------------
    zb1 = jnp.dot(x, w1_ref[...], preferred_element_type=jnp.float32) + b1_ref[...]
    # zb1[:, :128] = [z11 | z12 | 0],  zb1[:, 128:] = [0 | z11 | 0]
    # -> cat1 lanes = [l11 | l12 | 0] == torch.cat((l11, l12), 1) padded to 128.
    cat1 = jnp.maximum(zb1[:, :PAD] + jnp.maximum(zb1[:, PAD:], 0.0), 0.0)

    # ---- layer 2: same trick (plus a constant-1 feature at lane 96) -----------
    zb2 = jnp.dot(cat1, w2_ref[...], preferred_element_type=jnp.float32) + b2_ref[...]
    cat2 = jnp.maximum(zb2[:, :PAD] + jnp.maximum(zb2[:, PAD:], 0.0), 0.0)
    # cat2 lanes 0..95 = torch c2, lane 96 = 1.0 (carries the head bias), 97.. = 0.

    # ---- head on the VPU/XLU (no MXU): d = c2 . dcol + db ---------------------
    # w3_ref is a (1, 128) row: dcol in lanes 0..95, db at lane 96, zeros after.
    d = jnp.sum(cat2 * w3_ref[...], axis=-1, keepdims=True)        # (tb, 1)
    # sigmoid(z0 - z1) == softmax([z0, z1], axis=1)[:, 0] exactly.
    o_ref[...] = 1.0 / (1.0 + jnp.exp(-d))


def fuse_params(p):
    """Pack the five torch Linears into MXU/VPU-friendly fused operands.

    Call ONCE (outside the hot path); the result feeds linked_mlp directly.
    """
    f32 = jnp.float32
    in_dim = p["w11"].shape[0]

    # Layer 1: (in_dim, 256); second 128-lane half holds W11 shifted to lanes 48..95.
    w1 = jnp.zeros((in_dim, 2 * PAD), f32)
    w1 = w1.at[:, 0:HALF].set(p["w11"])
    w1 = w1.at[:, HALF:WIDTH].set(p["w12"])
    w1 = w1.at[:, PAD + HALF:PAD + WIDTH].set(p["w11"])
    b1 = jnp.zeros((1, 2 * PAD), f32)
    b1 = b1.at[:, 0:HALF].set(p["b11"])
    b1 = b1.at[:, HALF:WIDTH].set(p["b12"])
    b1 = b1.at[:, PAD + HALF:PAD + WIDTH].set(p["b11"])

    # Layer 2: rows 0..95 match the [l11 | l12] cat layout; rows 96..127 are zero.
    w2 = jnp.zeros((PAD, 2 * PAD), f32)
    w2 = w2.at[:WIDTH, 0:HALF].set(p["w21"])
    w2 = w2.at[:WIDTH, HALF:WIDTH].set(p["w22"])
    w2 = w2.at[:WIDTH, PAD + HALF:PAD + WIDTH].set(p["w21"])
    b2 = jnp.zeros((1, 2 * PAD), f32)
    b2 = b2.at[:, 0:HALF].set(p["b21"])
    b2 = b2.at[:, HALF:WIDTH].set(p["b22"])
    b2 = b2.at[:, PAD + HALF:PAD + WIDTH].set(p["b21"])
    # Constant-1 feature: cat2[:, 96] = relu(1.0 + relu(0)) = 1.0 for every row,
    # which carries the head bias through the VPU dot-product below.
    b2 = b2.at[:, WIDTH].set(1.0)

    # Head as a single (1, 128) row: softmax(., 2 classes) == sigmoid(z0 - z1).
    dcol = p["w3"][:, 0] - p["w3"][:, 1]                 # (96,)
    db = p["b3"][0, 0] - p["b3"][0, 1]
    w3 = jnp.zeros((1, PAD), f32)
    w3 = w3.at[0, :WIDTH].set(dcol)
    w3 = w3.at[0, WIDTH].set(db)                         # pairs with cat2 lane 96 == 1
    return w1, b1, w2, b2, w3


@partial(jax.jit, static_argnames=("block_rows",))
def linked_mlp(x, fused, block_rows=1024):
    """x: (B, input_dim) f32.  fused: output of fuse_params().  Returns (B, 2)."""
    B, in_dim = x.shape
    w1, b1, w2, b2, w3 = fused

    # Row tile: multiple of the f32 sublane tile (8); large enough to amortize the
    # ~0.35us/grid-step overhead, but capped at ~ceil(B/2) so there are >= 2 grid
    # blocks whenever possible (both v7x TensorCores get work via "parallel").
    half_rows = 8 * pl.cdiv(pl.cdiv(B, 2), 8)
    tb = max(8, min(block_rows, half_rows))
    n_blocks = pl.cdiv(B, tb)
    bp = n_blocks * tb          # no jnp.pad of x: the ragged last block is clamped
                                # by Pallas; garbage tail rows are per-row independent
                                # and sliced away below.

    const = lambda i: (0, 0)    # weights/biases stay VMEM-resident across the grid

    out = pl.pallas_call(
        _linked_mlp_kernel,
        out_shape=jax.ShapeDtypeStruct((bp, 1), jnp.float32),
        grid=(n_blocks,),
        in_specs=[
            pl.BlockSpec((tb, in_dim), lambda i: (i, 0)),
            pl.BlockSpec(w1.shape, const),
            pl.BlockSpec(b1.shape, const),
            pl.BlockSpec(w2.shape, const),
            pl.BlockSpec(b2.shape, const),
            pl.BlockSpec(w3.shape, const),
        ],
        out_specs=pl.BlockSpec((tb, 1), lambda i: (i, 0)),
        compiler_params=pltpu.CompilerParams(
            dimension_semantics=("parallel",),
            vmem_limit_bytes=48 * 1024 * 1024),
    )(x, w1, b1, w2, b2, w3)

    p0 = out[:B]                                  # (B, 1) == softmax(logits)[:, :1]
    return jnp.concatenate([p0, 1.0 - p0], axis=1)


def init_params(key, input_dim):
    """Deterministic init mimicking torch.nn.Linear default (uniform +-1/sqrt(fan_in)).
    Weights stored transposed: (in_features, out_features); biases (1, out_features)."""
    def linear(k, fan_in, fan_out):
        kw, kb = jax.random.split(k)
        bound = 1.0 / jnp.sqrt(fan_in)
        w = jax.random.uniform(kw, (fan_in, fan_out), jnp.float32, -bound, bound)
        b = jax.random.uniform(kb, (1, fan_out), jnp.float32, -bound, bound)
        return w, b

    ks = jax.random.split(key, 5)
    w11, b11 = linear(ks[0], input_dim, HALF)
    w12, b12 = linear(ks[1], input_dim, HALF)
    w21, b21 = linear(ks[2], SIZE, HALF)
    w22, b22 = linear(ks[3], SIZE, HALF)
    w3, b3 = linear(ks[4], SIZE, 2)
    return dict(w11=w11, b11=b11, w12=w12, b12=b12,
                w21=w21, b21=b21, w22=w22, b22=b22,
                w3=w3, b3=b3)


def reference(x, p):
    """Pure-JAX reference (canonical, unfused weights) for correctness check."""
    l11 = jax.nn.relu(x @ p["w11"] + p["b11"])
    l12 = jax.nn.relu(x @ p["w12"] + p["b12"] + l11)
    c1 = jnp.concatenate([l11, l12], axis=1)
    l21 = jax.nn.relu(c1 @ p["w21"] + p["b21"])
    l22 = jax.nn.relu(c1 @ p["w22"] + p["b22"] + l21)
    c2 = jnp.concatenate([l21, l22], axis=1)
    return jax.nn.softmax(c2 @ p["w3"] + p["b3"], axis=1)


if __name__ == "__main__":
    key = jax.random.PRNGKey(0)
    k_param, k_x = jax.random.split(key)

    batch, input_dim = 8, 32
    x = jax.random.normal(k_x, (batch, input_dim), dtype=jnp.float32)
    params = init_params(k_param, input_dim)

    fused = fuse_params(params)        # packed once, outside the per-call path
    out = linked_mlp(x, fused)
    out = jax.block_until_ready(out)

    ref = reference(x, params)
    assert out.shape == (batch, 2)
    assert jnp.allclose(out, ref, atol=1e-5, rtol=1e-5)
    assert jnp.allclose(jnp.sum(out, axis=1), 1.0, atol=1e-5)

    print("KERNEL_OK")
</pallas_src>

<mosaic_0001>
module attributes {stable_mosaic.version = 11 : i64} {
  func.func @_linked_mlp_kernel(%arg0: i32, %arg1: memref<8x32xf32, #tpu.memory_space<vmem>>, %arg2: memref<32x256xf32, #tpu.memory_space<vmem>>, %arg3: memref<1x256xf32, #tpu.memory_space<vmem>>, %arg4: memref<128x256xf32, #tpu.memory_space<vmem>>, %arg5: memref<1x256xf32, #tpu.memory_space<vmem>>, %arg6: memref<1x128xf32, #tpu.memory_space<vmem>>, %arg7: memref<8x1xf32, #tpu.memory_space<vmem>>) attributes {dimension_semantics = [#tpu.dimension_semantics<parallel>], iteration_bounds = array<i64: 1>, scalar_prefetch = 0 : i64, scratch_operands = 0 : i64, tpu.core_type = #tpu.core_type<tc>, window_params = [{transform_indices = @transform_0, window_bounds = array<i64: 8, 32>}, {pipeline_mode = #tpu.pipeline_mode<synchronous>, transform_indices = @transform_1, window_bounds = array<i64: 32, 256>}, {pipeline_mode = #tpu.pipeline_mode<synchronous>, transform_indices = @transform_2, window_bounds = array<i64: 1, 256>}, {pipeline_mode = #tpu.pipeline_mode<synchronous>, transform_indices = @transform_3, window_bounds = array<i64: 128, 256>}, {pipeline_mode = #tpu.pipeline_mode<synchronous>, transform_indices = @transform_4, window_bounds = array<i64: 1, 256>}, {pipeline_mode = #tpu.pipeline_mode<synchronous>, transform_indices = @transform_5, window_bounds = array<i64: 1, 128>}, {transform_indices = @transform_6, window_bounds = array<i64: 8, 1>}]} {
    %c0 = arith.constant 0 : index
    %c0_0 = arith.constant 0 : index
    %0 = vector.load %arg1[%c0, %c0_0] : memref<8x32xf32, #tpu.memory_space<vmem>>, vector<8x32xf32>
    %c0_1 = arith.constant 0 : index
    %c0_2 = arith.constant 0 : index
    %1 = vector.load %arg2[%c0_1, %c0_2] : memref<32x256xf32, #tpu.memory_space<vmem>>, vector<32x256xf32>
    %cst = arith.constant dense<0.000000e+00> : vector<8x256xf32>
    %2 = tpu.matmul %0, %1, %cst {dimension_numbers = #tpu.dot_dimension_numbers<[1], [0], [0], [1], [0, 0, 1, 1], [], []>} : vector<8x32xf32>, vector<32x256xf32>, vector<8x256xf32> -> vector<8x256xf32>
    %c0_3 = arith.constant 0 : index
    %c0_4 = arith.constant 0 : index
    %3 = vector.load %arg3[%c0_3, %c0_4] : memref<1x256xf32, #tpu.memory_space<vmem>>, vector<1x256xf32>
    %4 = vector.broadcast %3 : vector<1x256xf32> to vector<8x256xf32>
    %5 = arith.addf %2, %4 : vector<8x256xf32>
    %6 = vector.extract_strided_slice %5 {offsets = [0, 0], sizes = [8, 128], strides = [1, 1]} : vector<8x256xf32> to vector<8x128xf32>
    %7 = vector.extract_strided_slice %5 {offsets = [0, 128], sizes = [8, 128], strides = [1, 1]} : vector<8x256xf32> to vector<8x128xf32>
    %cst_5 = arith.constant 0.000000e+00 : f32
    %8 = vector.broadcast %cst_5 : f32 to vector<8x128xf32>
    %9 = arith.maximumf %7, %8 : vector<8x128xf32>
    %10 = arith.addf %6, %9 : vector<8x128xf32>
    %cst_6 = arith.constant 0.000000e+00 : f32
    %11 = vector.broadcast %cst_6 : f32 to vector<8x128xf32>
    %12 = arith.maximumf %10, %11 : vector<8x128xf32>
    %c0_7 = arith.constant 0 : index
    %c0_8 = arith.constant 0 : index
    %13 = vector.load %arg4[%c0_7, %c0_8] : memref<128x256xf32, #tpu.memory_space<vmem>>, vector<128x256xf32>
    %cst_9 = arith.constant dense<0.000000e+00> : vector<8x256xf32>
    %14 = tpu.matmul %12, %13, %cst_9 {dimension_numbers = #tpu.dot_dimension_numbers<[1], [0], [0], [1], [0, 0, 1, 1], [], []>} : vector<8x128xf32>, vector<128x256xf32>, vector<8x256xf32> -> vector<8x256xf32>
    %c0_10 = arith.constant 0 : index
    %c0_11 = arith.constant 0 : index
    %15 = vector.load %arg5[%c0_10, %c0_11] : memref<1x256xf32, #tpu.memory_space<vmem>>, vector<1x256xf32>
    %16 = vector.broadcast %15 : vector<1x256xf32> to vector<8x256xf32>
    %17 = arith.addf %14, %16 : vector<8x256xf32>
    %18 = vector.extract_strided_slice %17 {offsets = [0, 0], sizes = [8, 128], strides = [1, 1]} : vector<8x256xf32> to vector<8x128xf32>
    %19 = vector.extract_strided_slice %17 {offsets = [0, 128], sizes = [8, 128], strides = [1, 1]} : vector<8x256xf32> to vector<8x128xf32>
    %cst_12 = arith.constant 0.000000e+00 : f32
    %20 = vector.broadcast %cst_12 : f32 to vector<8x128xf32>
    %21 = arith.maximumf %19, %20 : vector<8x128xf32>
    %22 = arith.addf %18, %21 : vector<8x128xf32>
    %cst_13 = arith.constant 0.000000e+00 : f32
    %23 = vector.broadcast %cst_13 : f32 to vector<8x128xf32>
    %24 = arith.maximumf %22, %23 : vector<8x128xf32>
    %c0_14 = arith.constant 0 : index
    %c0_15 = arith.constant 0 : index
    %25 = vector.load %arg6[%c0_14, %c0_15] : memref<1x128xf32, #tpu.memory_space<vmem>>, vector<1x128xf32>
    %26 = vector.broadcast %25 : vector<1x128xf32> to vector<8x128xf32>
    %27 = arith.mulf %24, %26 : vector<8x128xf32>
    %cst_16 = arith.constant dense<0.000000e+00> : vector<8xf32>
    %28 = vector.multi_reduction <add>, %27, %cst_16 [1] : vector<8x128xf32> to vector<8xf32>
    %29 = vector.shape_cast %28 : vector<8xf32> to vector<8x1xf32>
    %cst_17 = arith.constant 0.000000e+00 : f32
    %30 = vector.broadcast %cst_17 : f32 to vector<8x1xf32>
    %31 = arith.subf %30, %29 : vector<8x1xf32>
    %32 = math.exp %31 : vector<8x1xf32>
    %cst_18 = arith.constant 1.000000e+00 : f32
    %33 = vector.broadcast %cst_18 : f32 to vector<8x1xf32>
    %34 = arith.addf %33, %32 : vector<8x1xf32>
    %cst_19 = arith.constant 1.000000e+00 : f32
    %35 = vector.broadcast %cst_19 : f32 to vector<8x1xf32>
    %36 = arith.divf %35, %34 : vector<8x1xf32>
    %c0_20 = arith.constant 0 : index
    %c0_21 = arith.constant 0 : index
    %37 = vector.load %arg7[%c0_20, %c0_21] : memref<8x1xf32, #tpu.memory_space<vmem>>, vector<8x1xf32>
    tpu.vector_store %arg7[%c0_20, %c0_21], %36 {strides = array<i32>} : memref<8x1xf32, #tpu.memory_space<vmem>>, vector<8x1xf32>,
    return
  }
  func.func @transform_0(%arg0: i32) -> (i32, i32) {
    %c0_i32 = arith.constant 0 : i32
    %c0_i32_0 = arith.constant 0 : i32
    return %arg0, %c0_i32 : i32, i32
  }
  func.func @transform_1(%arg0: i32) -> (i32, i32) {
    %c0_i32 = arith.constant 0 : i32
    %c0_i32_0 = arith.constant 0 : i32
    %c0_i32_1 = arith.constant 0 : i32
    return %c0_i32, %c0_i32_0 : i32, i32
  }
  func.func @transform_2(%arg0: i32) -> (i32, i32) {
    %c0_i32 = arith.constant 0 : i32
    %c0_i32_0 = arith.constant 0 : i32
    %c0_i32_1 = arith.constant 0 : i32
    return %c0_i32, %c0_i32_0 : i32, i32
  }
  func.func @transform_3(%arg0: i32) -> (i32, i32) {
    %c0_i32 = arith.constant 0 : i32
    %c0_i32_0 = arith.constant 0 : i32
    %c0_i32_1 = arith.constant 0 : i32
    return %c0_i32, %c0_i32_0 : i32, i32
  }
  func.func @transform_4(%arg0: i32) -> (i32, i32) {
    %c0_i32 = arith.constant 0 : i32
    %c0_i32_0 = arith.constant 0 : i32
    %c0_i32_1 = arith.constant 0 : i32
    return %c0_i32, %c0_i32_0 : i32, i32
  }
  func.func @transform_5(%arg0: i32) -> (i32, i32) {
    %c0_i32 = arith.constant 0 : i32
    %c0_i32_0 = arith.constant 0 : i32
    %c0_i32_1 = arith.constant 0 : i32
    return %c0_i32, %c0_i32_0 : i32, i32
  }
  func.func @transform_6(%arg0: i32) -> (i32, i32) {
    %c0_i32 = arith.constant 0 : i32
    %c0_i32_0 = arith.constant 0 : i32
    return %arg0, %c0_i32 : i32, i32
  }
}

</mosaic_0001>

<bundles_post_ra>
// kernel: linked_mlp.1
= control target key start
LH: loop header
LB: loop body
LE: loop exit
PB: predicated region body
PF: predicated region fallthrough
CT: control target
= control target key end

     0   :  { %11 = vsyncpa [#allocation3], 0  ;;  %s520_s0 = inlined_call_operand.hbm [shape: f32[8,32], index: 0, kind: input, shape index: {}]   ;;  %s521_s1 = inlined_call_operand.hbm [shape: f32[32,256], index: 1, kind: input, shape index: {}]   ;;  %s522_s2 = inlined_call_operand.vmem [shape: f32[1,256], index: 2, kind: input, shape index: {}]   ;;  %s523_s3 = inlined_call_operand.hbm [shape: f32[128,256], index: 3, kind: input, shape index: {}]   ;;  %s524_s4 = inlined_call_operand.vmem [shape: f32[1,256], index: 4, kind: input, shape index: {}]   ;;  %s525_s5 = inlined_call_operand.vmem [shape: f32[1,128], index: 5, kind: input, shape index: {}]   ;;  %s526_s6 = inlined_call_operand.vmem [shape: f32[8,1], index: 6, kind: output, shape index: {}]  }
   0x1   :  { %12 = vsyncpa [#allocation5], 0  ;;  %s425_s21 = smov [#allocation4]   ;;  %s355_s25 = scalar_lea.hbm %s521_s1, 1024 }
   0x2   :  { %s28_s22 = sshll.u32 %s425_s21, 4  ;;  %p356_p0 = scmp.ne.s32.totalorder %s521_s1, %s355_s25  ;;  %s29_s22 = int_to_ptr.vmem [resolvable:$true] %s28_s22 }
   0x3   :  { %p359_p1 = scmp.lt.u32.totalorder %s355_s25, %s521_s1 }
   0x5   :  { %p361_p2 = pnand %p359_p1, %p356_p0 }
   0x7   :  { %364 = shalt.err (!%p361_p2)
}
   0x8   :  { %s365_s30 = scalar_lea.vmem %s29_s22, 1024  ;;  %p370_p4 = scmp.lt.s32.totalorder %s29_s22, %s29_s22 }
   0x9   :  { %p366_p3 = scmp.ne.s32.totalorder %s29_s22, %s365_s30  ;;  %p371_p5 = scmp.lt.s32.totalorder %s365_s30, %s365_s30 }
   0xb   :  { %p372_p6 = por %p371_p5, %p370_p4 }
   0xd   :  { %p373_p7 = pnand %p372_p6, %p366_p3 }
   0xf   :  { %376 = shalt.err (!%p373_p7)
}
  0x10   :  { %s426_s7 = smov 256   ;;  %s427_s8 = smov 16  }
  0x11   :  { %34 = dma.hbm_to_vmem [thread:$0]  %s521_s1, 1024, %s29_s22, [#allocation5], %s426_s7, %s426_s7, %s427_s8  }
  0x12   :  { %s428_s11 = smov [#allocation2]   ;;  %s429_s13 = smov [#allocation6]  }
  0x13   :  { %s19_s12 = sshll.u32 %s428_s11, 4  ;;  %s42_s14 = sshll.u32 %s429_s13, 4  ;;  %s20_s12 = int_to_ptr.vmem [resolvable:$true] %s19_s12  ;;  %s43_s14 = int_to_ptr.vmem [resolvable:$true] %s42_s14 }
  0x14   :  { %s377_s17 = scalar_lea.hbm %s520_s0, 128 }
  0x15   :  { %p378_p8 = scmp.ne.s32.totalorder %s520_s0, %s377_s17  ;;  %p381_p9 = scmp.lt.u32.totalorder %s377_s17, %s520_s0 }
  0x17   :  { %p383_p10 = pnand %p381_p9, %p378_p8 }
  0x19   :  { %386 = shalt.err (!%p383_p10)
}
  0x1a   :  { %s387_s1 = scalar_lea.vmem %s20_s12, 128  ;;  %p392_p12 = scmp.lt.s32.totalorder %s20_s12, %s20_s12 }
  0x1b   :  { %p388_p11 = scmp.ne.s32.totalorder %s20_s12, %s387_s1  ;;  %p393_p13 = scmp.lt.s32.totalorder %s387_s1, %s387_s1 }
  0x1d   :  { %p394_p0 = por %p393_p13, %p392_p12 }
  0x1f   :  { %p395_p1 = pnand %p394_p0, %p388_p11 }
  0x21   :  { %398 = shalt.err (!%p395_p1)
}
  0x22   :  { %22 = dma.hbm_to_vmem [thread:$0]  %s520_s0, 128, %s20_s12, [#allocation3]  }
  0x23   :  { %s399_s26 = scalar_lea.hbm %s523_s3, 4096 }
  0x24   :  { %p400_p2 = scmp.ne.s32.totalorder %s523_s3, %s399_s26  ;;  %p403_p3 = scmp.lt.u32.totalorder %s399_s26, %s523_s3 }
  0x26   :  { %p405_p4 = pnand %p403_p3, %p400_p2 }
  0x28   :  { %408 = shalt.err (!%p405_p4)
}
  0x29   :  { %s409_s9 = scalar_lea.vmem %s43_s14, 4096  ;;  %p414_p6 = scmp.lt.s32.totalorder %s43_s14, %s43_s14 }
  0x2a   :  { %p410_p5 = scmp.ne.s32.totalorder %s43_s14, %s409_s9  ;;  %p415_p7 = scmp.lt.s32.totalorder %s409_s9, %s409_s9 }
  0x2c   :  { %p416_p8 = por %p415_p7, %p414_p6 }
  0x2e   :  { %p417_p9 = pnand %p416_p8, %p410_p5 }
  0x30   :  { %420 = shalt.err (!%p417_p9)
}
  0x31   :  { %48 = dma.hbm_to_vmem [thread:$0]  %s523_s3, 4096, %s43_s14, [#allocation5], %s426_s7, %s426_s7, %s427_s8  }
  0x32   :  { %421 = dma.done.wait [#allocation3], 128  }
  0x33   :  { %422 = vsyncadd [#allocation3], 4294967168 }
  0x34   :  { %423 = dma.done.wait [#allocation5], 5120  }
  0x35   :  { %424 = vsyncadd [#allocation5], 4294962176  ;;  %v430_v0 = vmov 0.0   ;;  %v64_v1 = vld [vmem:[#allocation4 + $0x8] sm:$0xff]  ;;  %v66_v2 = vld [vmem:[#allocation4 + $0x18] sm:$0xff]  ;;  %vm83_vm0 = vcmask 261120   ;;  %v73_v62 = vlaneseq }
  0x36   :  { %151 = vmatprep.mubr.f32.mxu0 %v430_v0  ;;  %269 = vmatprep.mubr.f32.mxu1 %v430_v0  ;;  %v63_v3 = vld [vmem:[#allocation4] sm:$0xff]  ;;  %v305_v4 = vpack.c.bf16 %v66_v2, %v64_v1  ;;  %v65_v5 = vld [vmem:[#allocation4 + $0x10] sm:$0xff]  ;;  %v68_v6 = vld [vmem:[#allocation4 + $0x28] sm:$0xff]  ;;  %vm295_vm1 = vcmask 7168  }
  0x37   :  { %v70_v7 = vld [vmem:[#allocation4 + $0x38] sm:$0xff]  ;;  %v307_v8 = vpack.c.bf16 %v65_v5, %v63_v3  ;;  %v67_v10 = vld [vmem:[#allocation4 + $0x20] sm:$0xff]  ;;  %v69_v11 = vld [vmem:[#allocation4 + $0x30] sm:$0xff]  ;;  %v74_v63 = vshrl.u32 %v73_v62, 7 }
  0x38   :  { %v309_v9 = vpack.c.bf16 %v70_v7, %v68_v6  ;;  %306 = vmatprep.subr.bf16.mxu0 %v305_v4  ;;  %v162_v12 = vld [vmem:[#allocation6 + $0x8] sm:$0xff]  ;;  %v164_v13 = vld [vmem:[#allocation6 + $0x18] sm:$0xff]  ;;  %v161_v14 = vld [vmem:[#allocation6] sm:$0xff]  ;;  %v311_v15 = vpack.c.bf16 %v69_v11, %v67_v10 }
  0x39   :  { %308 = vmatpush1.bf16.msra.mxu0 %v307_v8  ;;  %v313_v16 = vpack.c.bf16 %v164_v13, %v162_v12  ;;  %v163_v17 = vld [vmem:[#allocation6 + $0x10] sm:$0xff]  ;;  %v166_v18 = vld [vmem:[#allocation6 + $0x28] sm:$0xff]  ;;  %v168_v19 = vld [vmem:[#allocation6 + $0x38] sm:$0xff]  ;;  %v79_v0 = vsub.s32 1, %v74_v63  ;;  %v75_v2 = vsub.s32 0, %v74_v63 }
  0x3a   :  { %310 = vmatprep.subr.bf16.mxu0 %v309_v9  ;;  %v315_v20 = vpack.c.bf16 %v163_v17, %v161_v14  ;;  %v317_v21 = vpack.c.bf16 %v168_v19, %v166_v18  ;;  %v165_v22 = vld [vmem:[#allocation6 + $0x20] sm:$0xff]  ;;  %v167_v23 = vld [vmem:[#allocation6 + $0x30] sm:$0xff]  ;;  %v170_v24 = vld [vmem:[#allocation6 + $0x48] sm:$0xff] }
  0x3b   :  { %314 = vmatprep.subr.bf16.mxu1 %v313_v16  ;;  %v172_v25 = vld [vmem:[#allocation6 + $0x58] sm:$0xff]  ;;  %v319_v26 = vpack.c.bf16 %v167_v23, %v165_v22  ;;  %v169_v29 = vld [vmem:[#allocation6 + $0x40] sm:$0xff]  ;;  %v171_v30 = vld [vmem:[#allocation6 + $0x50] sm:$0xff] }
  0x3c   :  { %316 = vmatpush1.bf16.msra.mxu1 %v315_v20  ;;  %v62_v27 = vld [vmem:[#allocation2] sm:$0xff]  ;;  %v321_v28 = vpack.c.bf16 %v172_v25, %v170_v24  ;;  %v174_v31 = vld [vmem:[#allocation6 + $0x68] sm:$0xff]  ;;  %v323_v33 = vpack.c.bf16 %v171_v30, %v169_v29  ;;  %v173_v35 = vld [vmem:[#allocation6 + $0x60] sm:$0xff] }
  0x3d   :  { %312 = vmatpush1.bf16.msra.mxu0 %v311_v15  ;;  %318 = vmatprep.subr.bf16.mxu1 %v317_v21  ;;  %v176_v32 = vld [vmem:[#allocation6 + $0x78] sm:$0xff]  ;;  %v175_v36 = vld [vmem:[#allocation6 + $0x70] sm:$0xff]  ;;  %v178_v37 = vld [vmem:[#allocation6 + $0x88] sm:$0xff] }
  0x3e   :  { %v325_v34 = vpack.c.bf16 %v176_v32, %v174_v31  ;;  %v180_v38 = vld [vmem:[#allocation6 + $0x98] sm:$0xff]  ;;  %v327_v39 = vpack.c.bf16 %v175_v36, %v173_v35  ;;  %v177_v41 = vld [vmem:[#allocation6 + $0x80] sm:$0xff]  ;;  %v179_v42 = vld [vmem:[#allocation6 + $0x90] sm:$0xff] }
  0x3f   :  { %v329_v40 = vpack.c.bf16 %v180_v38, %v178_v37  ;;  %v182_v43 = vld [vmem:[#allocation6 + $0xa8] sm:$0xff]  ;;  %v184_v44 = vld [vmem:[#allocation6 + $0xb8] sm:$0xff]  ;;  %v331_v45 = vpack.c.bf16 %v179_v42, %v177_v41  ;;  %v181_v47 = vld [vmem:[#allocation6 + $0xa0] sm:$0xff] }
  0x40   :  { %303 = vmatmul.mubr.msk.f32.vlgmr.msra.gmra.mrb[0].mxu0 %vm83_vm0, %v62_v27  ;;  %320 = vmatpush1.bf16.msra.mxu1 %v319_v26  ;;  %v333_v46 = vpack.c.bf16 %v184_v44, %v182_v43  ;;  %v183_v48 = vld [vmem:[#allocation6 + $0xb0] sm:$0xff]  ;;  %v186_v50 = vld [vmem:[#allocation6 + $0xc8] sm:$0xff]  ;;  %v188_v51 = vld [vmem:[#allocation6 + $0xd8] sm:$0xff] }
  0x41   :  { %322 = vmatprep.subr.bf16.mxu1 %v321_v28  ;;  %v335_v49 = vpack.c.bf16 %v183_v48, %v181_v47  ;;  %v337_v52 = vpack.c.bf16 %v188_v51, %v186_v50  ;;  %v185_v53 = vld [vmem:[#allocation6 + $0xc0] sm:$0xff]  ;;  %v187_v54 = vld [vmem:[#allocation6 + $0xd0] sm:$0xff]  ;;  %v190_v56 = vld [vmem:[#allocation6 + $0xe8] sm:$0xff] }
  0x42   :  { %v339_v55 = vpack.c.bf16 %v187_v54, %v185_v53  ;;  %v192_v57 = vld [vmem:[#allocation6 + $0xf8] sm:$0xff]  ;;  %v189_v59 = vld [vmem:[#allocation6 + $0xe0] sm:$0xff]  ;;  %v191_v60 = vld [vmem:[#allocation6 + $0xf0] sm:$0xff] }
  0x43   :  { %v341_v58 = vpack.c.bf16 %v192_v57, %v190_v56  ;;  %v343_v61 = vpack.c.bf16 %v191_v60, %v189_v59  ;;  %v71_v1 = vld [vmem:[%s522_s2] sm:$0x3] }
  0x44   :  { %324 = vmatpush1.bf16.msra.mxu1 %v323_v33  ;;  %v80_v3 = vrot.slane %v71_v1, %v79_v0  ;;  %v76_v4 = vrot.slane %v71_v1, %v75_v2  ;;  %v193_v12 = vld [vmem:[%s524_s4] sm:$0x3] }
  0x45   :  { %326 = vmatprep.subr.bf16.mxu1 %v325_v34  ;;  %v202_v13 = vrot.slane %v193_v12, %v79_v0  ;;  %v198_v14 = vrot.slane %v193_v12, %v75_v2  ;;  %v304_v21 = vld [vmem:[%s525_s5] ss:$0 sm:$0xff] }
  0x48   :  { %328 = vmatpush1.bf16.msra.mxu1 %v327_v39 }
  0x49   :  { %330 = vmatprep.subr.bf16.mxu1 %v329_v40 }
  0x4c   :  { %332 = vmatpush1.bf16.msra.mxu1 %v331_v45 }
  0x4d   :  { %334 = vmatprep.subr.bf16.mxu1 %v333_v46 }
  0x50   :  { %336 = vmatpush1.bf16.msra.mxu1 %v335_v49 }
  0x51   :  { %338 = vmatprep.subr.bf16.mxu1 %v337_v52 }
  0x54   :  { %340 = vmatpush1.bf16.msra.mxu1 %v339_v55 }
  0x55   :  { %342 = vmatprep.subr.bf16.mxu1 %v341_v58 }
  0x58   :  { %344 = vmatpush1.bf16.msra.mxu1 %v343_v61 }
 0x113   :  { %v153_v5 = vpop.f32.mrb[0].mxu0 }
 0x114   :  { %v155_v6 = vpop.f32.mrb[1].mxu0  ;;  %v154_v8 = vadd.f32 %v153_v5, %v76_v4 }
 0x115   :  { %v156_v7 = vadd.f32 %v155_v6, %v80_v3 }
 0x117   :  { %v158_v9 = vmax.f32 %v156_v7, 0.0 }
 0x119   :  { %v159_v10 = vadd.f32 %v158_v9, %v154_v8 }
 0x11b   :  { %v160_v11 = vmax.f32 %v159_v10, 0.0 }
 0x11d   :  { %270 = vmatmul.mubr.f32.vlgmr.msra.gmra.mrb[0].mxu1 %v160_v11 }
 0x1f0   :  { %v271_v15 = vpop.f32.mrb[0].mxu1 }
 0x1f1   :  { %v273_v16 = vpop.f32.mrb[1].mxu1  ;;  %v272_v18 = vadd.f32 %v271_v15, %v198_v14 }
 0x1f2   :  { %v274_v17 = vadd.f32 %v273_v16, %v202_v13 }
 0x1f4   :  { %v276_v19 = vmax.f32 %v274_v17, 0.0 }
 0x1f6   :  { %v277_v20 = vadd.f32 %v276_v19, %v272_v18 }
 0x1f8   :  { %v278_v22 = vmax.f32 %v277_v20, 0.0 }
 0x1fa   :  { %v286_v23 = vmul.f32 %v304_v21, %v278_v22 }
 0x1fc   :  { %287 = vadd.xlane.f32.xlu0 %v286_v23 }
 0x289   :  { %v288_v24 = vpop.xlane.xlu0 %287 }
 0x28a   :  { %v289_v25 = vsub.f32 0.0, %v288_v24 }
 0x28c   :  { %v290_v26 = vmul.f32 1.442695, %v289_v25 }
 0x28e   :  { %351 = vpow2.f32 %v290_v26 }
 0x298   :  { %v352_v27 = vpop.eup %351 }
 0x299   :  { %v292_v28 = vadd.f32 1.0, %v352_v27 }
 0x29b   :  { %353 = vrcp.f32 %v292_v28 }
 0x2a5   :  { %v354_v29 = vpop.eup %353 }
 0x2a6   :  { %296 = vst.msk [vmem:[%s526_s6] sm:$0xff] %vm295_vm1, %v354_v29 }
 0x2a7   :  { %301 = vsyncpa [#allocation3], 1 }
 0x2a8   :  { %302 = vsyncpa [#allocation5], 1 }

</bundles_post_ra>
